<compile_context>
chip_gen: v5e
topology: v5e:2x2
jax: 0.10.0
libtpu: 0.0.40
codegen_flags: <defaults>
</compile_context>

<pallas_src>
import functools

import jax
import jax.numpy as jnp
from jax.experimental import pallas as pl
from jax.experimental.pallas import tpu as pltpu

OBS_N = 4
HIDDEN_N = 32
ACT_N = 3            # MountainCar-v0 action space
LANE = 128           # TPU lane width (hidden layers live at 128 lanes in VMEM only)
OBS_PAD = 8          # obs padded to 8 lanes (lane OBS_N holds the constant 1.0 for b1)
ACT_PAD = 8          # output padded to 8 lanes
MAX_TILE_B = 2048    # rows per grid step for large batches


def _sigmoid(x):
    # exp and reciprocal both issue on the EUP slot; exact enough for f32 parity.
    return pl.reciprocal(1.0 + jnp.exp(-x), approx=False)


def mlp_kernel(obs_ref, w_ref, out_ref):
    x = obs_ref[...]                                   # (tile_b, 8); lane OBS_N == 1.0
    # fc1 (+ folded b1): contraction over the 8 obs lanes against an aligned 8-sublane slab slice.
    z1 = jnp.dot(x, w_ref[0:OBS_PAD, 0:LANE], preferred_element_type=jnp.float32)
    h1 = _sigmoid(z1)                                  # padded lanes == sigmoid(0) == 0.5 exactly
    # fc2 (+ folded b2 via the 0.5 lanes * 2*b2 row)
    z2 = jnp.dot(h1, w_ref[:, LANE:2 * LANE], preferred_element_type=jnp.float32)
    h2 = _sigmoid(z2)                                  # padded lanes == 0.5 exactly
    # fc3 (+ folded b3); lanes >= ACT_N are exactly 0.  Store only the 8-lane output slab.
    z3 = jnp.dot(h2, w_ref[:, 2 * LANE:3 * LANE], preferred_element_type=jnp.float32)
    out_ref[...] = z3[:, 0:ACT_PAD]


def pack_params(params):
    """Pack weights + folded biases into ONE (128, 384) f32 slab.

    segment 0 (cols   0:128): rows 0:4 = w1, row 4 = b1      (obs lane 4 is 1.0)
    segment 1 (cols 128:256): rows 0:32 = w2, row 32 = 2*b2  (padded h1 lanes are 0.5)
    segment 2 (cols 256:384): rows 0:32 = w3, row 32 = 2*b3  (padded h2 lanes are 0.5)
    All other entries are zero, which keeps padded lanes exactly 0 / 0.5 as required.
    """
    w1, b1, w2, b2, w3, b3 = params
    w = jnp.zeros((LANE, 3 * LANE), jnp.float32)
    w = w.at[:OBS_N, 0:HIDDEN_N].set(w1)
    w = w.at[OBS_N, 0:HIDDEN_N].set(b1)
    w = w.at[:HIDDEN_N, LANE:LANE + HIDDEN_N].set(w2)
    w = w.at[HIDDEN_N, LANE:LANE + HIDDEN_N].set(2.0 * b2)
    w = w.at[:HIDDEN_N, 2 * LANE:2 * LANE + ACT_N].set(w3)
    w = w.at[HIDDEN_N, 2 * LANE:2 * LANE + ACT_N].set(2.0 * b3)
    return w


@functools.partial(jax.jit, static_argnames=("tile_b",))
def _forward_padded(obs_p, w_slab, tile_b):
    b_pad = obs_p.shape[0]
    return pl.pallas_call(
        mlp_kernel,
        out_shape=jax.ShapeDtypeStruct((b_pad, ACT_PAD), jnp.float32),
        grid_spec=pltpu.PrefetchScalarGridSpec(
            num_scalar_prefetch=0,
            grid=(b_pad // tile_b,),
            in_specs=[
                # obs: tiled over batch, 8 lanes (== full array last dim -> legal block)
                pl.BlockSpec((tile_b, OBS_PAD), lambda i: (i, 0)),
                # weight slab: VMEM-resident (constant block index across the grid)
                pl.BlockSpec((LANE, 3 * LANE), lambda i: (0, 0)),
            ],
            out_specs=pl.BlockSpec((tile_b, ACT_PAD), lambda i: (i, 0)),
        ),
        compiler_params=pltpu.CompilerParams(
            dimension_semantics=("parallel",),   # megacore sharding on v7x; no-op on v5e/v6e
        ),
    )(obs_p, w_slab)


def model_forward(obs, w_slab, max_tile_b=MAX_TILE_B):
    """obs: (B, OBS_N) f32, w_slab: pack_params(params) -> (B, ACT_N) f32."""
    B = obs.shape[0]
    # Bucket the padded batch to the next power of two (>= 8) to limit recompiles.
    b_bucket = max(8, 1 << max(B - 1, 0).bit_length())
    # Split into >= 2 tiles when possible so both v7x TensorCores get work.
    tile_b = b_bucket if b_bucket <= 8 else min(max_tile_b, b_bucket // 2)
    # Row padding only; feature padding is 8 lanes with lane OBS_N == 1.0 (bias fold).
    obs_p = jnp.zeros((b_bucket, OBS_PAD), jnp.float32)
    obs_p = obs_p.at[:, OBS_N].set(1.0)
    obs_p = obs_p.at[:B, :OBS_N].set(obs.astype(jnp.float32))
    out = _forward_padded(obs_p, w_slab, tile_b)
    return out[:B, :ACT_N]


def init_params(key):
    """Mirror the PyTorch module: weights ~ N(0, 0.1), biases = 0; weights kept (in, out)."""
    k1, k2, k3 = jax.random.split(key, 3)
    w1 = jax.random.normal(k1, (OBS_N, HIDDEN_N), jnp.float32) * 0.1
    b1 = jnp.zeros((HIDDEN_N,), jnp.float32)
    w2 = jax.random.normal(k2, (HIDDEN_N, HIDDEN_N), jnp.float32) * 0.1
    b2 = jnp.zeros((HIDDEN_N,), jnp.float32)
    w3 = jax.random.normal(k3, (HIDDEN_N, ACT_N), jnp.float32) * 0.1
    b3 = jnp.zeros((ACT_N,), jnp.float32)
    return (w1, b1, w2, b2, w3, b3)


def reference_forward(obs, params):
    w1, b1, w2, b2, w3, b3 = params
    h1 = jax.nn.sigmoid(obs @ w1 + b1)
    h2 = jax.nn.sigmoid(h1 @ w2 + b2)
    return h2 @ w3 + b3


if __name__ == "__main__":
    key = jax.random.PRNGKey(0)
    k_obs, k_obs2, k_params, k_bias = jax.random.split(key, 4)
    params = init_params(k_params)
    w_slab = pack_params(params)     # packed once, reused across forward calls

    # Small batch (single grid step), zero biases (matches the module's init).
    batch = 8
    obs = jax.random.normal(k_obs, (batch, OBS_N), jnp.float32)
    out = jax.block_until_ready(model_forward(obs, w_slab))
    ref = reference_forward(obs, params)
    assert out.shape == (batch, ACT_N)
    assert jnp.allclose(out, ref, atol=2e-5, rtol=2e-5), float(jnp.max(jnp.abs(out - ref)))

    # Ragged batch + nonzero biases: exercises row padding, bucketing, and the exact bias fold.
    batch2 = 37
    obs2 = jax.random.normal(k_obs2, (batch2, OBS_N), jnp.float32)
    kb1, kb2, kb3 = jax.random.split(k_bias, 3)
    w1, _, w2, _, w3, _ = params
    params2 = (
        w1, 0.1 * jax.random.normal(kb1, (HIDDEN_N,), jnp.float32),
        w2, 0.1 * jax.random.normal(kb2, (HIDDEN_N,), jnp.float32),
        w3, 0.1 * jax.random.normal(kb3, (ACT_N,), jnp.float32),
    )
    w_slab2 = pack_params(params2)
    out2 = jax.block_until_ready(model_forward(obs2, w_slab2))
    ref2 = reference_forward(obs2, params2)
    assert out2.shape == (batch2, ACT_N)
    assert jnp.allclose(out2, ref2, atol=2e-5, rtol=2e-5), float(jnp.max(jnp.abs(out2 - ref2)))

    print("KERNEL_OK")
</pallas_src>

<mosaic_0001>
module attributes {stable_mosaic.version = 11 : i64} {
  func.func @mlp_kernel(%arg0: i32, %arg1: memref<8x8xf32, #tpu.memory_space<vmem>>, %arg2: memref<128x384xf32, #tpu.memory_space<vmem>>, %arg3: memref<8x8xf32, #tpu.memory_space<vmem>>) attributes {dimension_semantics = [#tpu.dimension_semantics<parallel>], iteration_bounds = array<i64: 1>, scalar_prefetch = 0 : i64, scratch_operands = 0 : i64, tpu.core_type = #tpu.core_type<tc>, window_params = [{transform_indices = @transform_0, window_bounds = array<i64: 8, 8>}, {pipeline_mode = #tpu.pipeline_mode<synchronous>, transform_indices = @transform_1, window_bounds = array<i64: 128, 384>}, {transform_indices = @transform_2, window_bounds = array<i64: 8, 8>}]} {
    %c0 = arith.constant 0 : index
    %c0_0 = arith.constant 0 : index
    %0 = vector.load %arg1[%c0, %c0_0] : memref<8x8xf32, #tpu.memory_space<vmem>>, vector<8x8xf32>
    %c0_1 = arith.constant 0 : index
    %c0_2 = arith.constant 0 : index
    %1 = vector.load %arg2[%c0_1, %c0_2] : memref<128x384xf32, #tpu.memory_space<vmem>>, vector<8x128xf32>
    %cst = arith.constant dense<0.000000e+00> : vector<8x128xf32>
    %2 = tpu.matmul %0, %1, %cst {dimension_numbers = #tpu.dot_dimension_numbers<[1], [0], [0], [1], [0, 0, 1, 1], [], []>} : vector<8x8xf32>, vector<8x128xf32>, vector<8x128xf32> -> vector<8x128xf32>
    %cst_3 = arith.constant 0.000000e+00 : f32
    %3 = vector.broadcast %cst_3 : f32 to vector<8x128xf32>
    %4 = arith.subf %3, %2 : vector<8x128xf32>
    %5 = math.exp %4 : vector<8x128xf32>
    %cst_4 = arith.constant 1.000000e+00 : f32
    %6 = vector.broadcast %cst_4 : f32 to vector<8x128xf32>
    %7 = arith.addf %6, %5 : vector<8x128xf32>
    %8 = tpu.reciprocal %7 : vector<8x128xf32> -> vector<8x128xf32>
    %c0_5 = arith.constant 0 : index
    %c128 = arith.constant 128 : index
    %9 = vector.load %arg2[%c0_5, %c128] : memref<128x384xf32, #tpu.memory_space<vmem>>, vector<128x128xf32>
    %cst_6 = arith.constant dense<0.000000e+00> : vector<8x128xf32>
    %10 = tpu.matmul %8, %9, %cst_6 {dimension_numbers = #tpu.dot_dimension_numbers<[1], [0], [0], [1], [0, 0, 1, 1], [], []>} : vector<8x128xf32>, vector<128x128xf32>, vector<8x128xf32> -> vector<8x128xf32>
    %cst_7 = arith.constant 0.000000e+00 : f32
    %11 = vector.broadcast %cst_7 : f32 to vector<8x128xf32>
    %12 = arith.subf %11, %10 : vector<8x128xf32>
    %13 = math.exp %12 : vector<8x128xf32>
    %cst_8 = arith.constant 1.000000e+00 : f32
    %14 = vector.broadcast %cst_8 : f32 to vector<8x128xf32>
    %15 = arith.addf %14, %13 : vector<8x128xf32>
    %16 = tpu.reciprocal %15 : vector<8x128xf32> -> vector<8x128xf32>
    %c0_9 = arith.constant 0 : index
    %c256 = arith.constant 256 : index
    %17 = vector.load %arg2[%c0_9, %c256] : memref<128x384xf32, #tpu.memory_space<vmem>>, vector<128x128xf32>
    %cst_10 = arith.constant dense<0.000000e+00> : vector<8x128xf32>
    %18 = tpu.matmul %16, %17, %cst_10 {dimension_numbers = #tpu.dot_dimension_numbers<[1], [0], [0], [1], [0, 0, 1, 1], [], []>} : vector<8x128xf32>, vector<128x128xf32>, vector<8x128xf32> -> vector<8x128xf32>
    %19 = vector.extract_strided_slice %18 {offsets = [0, 0], sizes = [8, 8], strides = [1, 1]} : vector<8x128xf32> to vector<8x8xf32>
    %c0_11 = arith.constant 0 : index
    %c0_12 = arith.constant 0 : index
    %20 = vector.load %arg3[%c0_11, %c0_12] : memref<8x8xf32, #tpu.memory_space<vmem>>, vector<8x8xf32>
    tpu.vector_store %arg3[%c0_11, %c0_12], %19 {strides = array<i32>} : memref<8x8xf32, #tpu.memory_space<vmem>>, vector<8x8xf32>,
    return
  }
  func.func @transform_0(%arg0: i32) -> (i32, i32) {
    %c0_i32 = arith.constant 0 : i32
    %c0_i32_0 = arith.constant 0 : i32
    return %arg0, %c0_i32 : i32, i32
  }
  func.func @transform_1(%arg0: i32) -> (i32, i32) {
    %c0_i32 = arith.constant 0 : i32
    %c0_i32_0 = arith.constant 0 : i32
    %c0_i32_1 = arith.constant 0 : i32
    return %c0_i32, %c0_i32_0 : i32, i32
  }
  func.func @transform_2(%arg0: i32) -> (i32, i32) {
    %c0_i32 = arith.constant 0 : i32
    %c0_i32_0 = arith.constant 0 : i32
    return %arg0, %c0_i32 : i32, i32
  }
}

</mosaic_0001>

<bundles_post_ra>
// kernel: _forward_padded.1
= control target key start
LH: loop header
LB: loop body
LE: loop exit
PB: predicated region body
PF: predicated region fallthrough
CT: control target
= control target key end

     0   :  { %7 = vsyncpa [#allocation3], 0  ;;  %s318_s0 = inlined_call_operand.hbm [shape: f32[8,8], index: 0, kind: input, shape index: {}]   ;;  %s319_s1 = inlined_call_operand.hbm [shape: f32[128,384], index: 1, kind: input, shape index: {}]   ;;  %s320_s2 = inlined_call_operand.hbm [shape: f32[8,8], index: 2, kind: output, shape index: {}]  }
   0x1   :  { %8 = vsyncpa [#allocation6], 0 }
   0x2   :  { %9 = vsyncpa [#allocation4], 0  ;;  %s15_s11 = sshll.u32 %s318_s0, 4  ;;  %s287_s12 = smov [#allocation2]   ;;  %s16_s11 = int_to_ptr.hbm [resolvable:$true] %s15_s11 }
   0x3   :  { %s17_s13 = sshll.u32 %s287_s12, 4  ;;  %s25_s16 = sshll.u32 %s319_s1, 4  ;;  %s18_s13 = int_to_ptr.vmem [resolvable:$true] %s17_s13  ;;  %s26_s16 = int_to_ptr.hbm [resolvable:$true] %s25_s16 }
   0x4   :  { %20 = dma.hbm_to_vmem [thread:$0]  %s16_s11, 128, %s18_s13, [#allocation3]  }
   0x5   :  { %s288_s17 = smov [#allocation5]   ;;  %s289_s19 = smov 384  }
   0x6   :  { %s27_s18 = sshll.u32 %s288_s17, 4  ;;  %s290_s20 = smov 24   ;;  %s28_s18 = int_to_ptr.vmem [resolvable:$true] %s27_s18 }
   0x7   :  { %33 = dma.hbm_to_vmem [thread:$0]  %s26_s16, 6144, %s28_s18, [#allocation6], %s289_s19, %s289_s19, %s290_s20  }
   0x8   :  { %281 = dma.done.wait [#allocation3], 128  }
   0x9   :  { %282 = vsyncadd [#allocation3], 4294967168 }
   0xa   :  { %283 = dma.done.wait [#allocation6], 6144  }
   0xb   :  { %284 = vsyncadd [#allocation6], 4294961152  ;;  %vm44_vm0 = vcmask 64512   ;;  %v43_v0 = vld [vmem:[#allocation5] sm:$0xff]  ;;  %v42_v1 = vld [vmem:[#allocation2] sm:$0xff]  ;;  %s291_s0 = smov [#allocation7]  }
   0xc   :  { %63 = vmatpush.msra.mxu0 %v43_v0  ;;  %v101_v2 = vld [vmem:[#allocation5 + $0x170] sm:$0xff]  ;;  %v100_v3 = vld [vmem:[#allocation5 + $0x158] sm:$0xff]  ;;  %v99_v4 = vld [vmem:[#allocation5 + $0x140] sm:$0xff]  ;;  %s182_s1 = sshll.u32 %s291_s0, 4  ;;  %s184_s23 = sshll.u32 %s320_s2, 4  ;;  %s183_s1 = int_to_ptr.vmem [resolvable:$true] %s182_s1  ;;  %s185_s23 = int_to_ptr.hbm [resolvable:$true] %s184_s23 }
   0xd   :  { %195 = vmatmul.msk.f32.vlgmr.msra.gmra.mxu0 %vm44_vm0, %v42_v1  ;;  %102 = vmatpush.msra.mxu1 %v101_v2  ;;  %v98_v5 = vld [vmem:[#allocation5 + $0x128] sm:$0xff]  ;;  %v97_v6 = vld [vmem:[#allocation5 + $0x110] sm:$0xff]  ;;  %v96_v7 = vld [vmem:[#allocation5 + $0xf8] sm:$0xff] }
   0xe   :  { %v95_v8 = vld [vmem:[#allocation5 + $0xe0] sm:$0xff]  ;;  %v94_v9 = vld [vmem:[#allocation5 + $0xc8] sm:$0xff]  ;;  %v93_v10 = vld [vmem:[#allocation5 + $0xb0] sm:$0xff] }
   0xf   :  { %103 = vmatpush.msra.mxu1 %v100_v3  ;;  %v92_v11 = vld [vmem:[#allocation5 + $0x98] sm:$0xff]  ;;  %v91_v12 = vld [vmem:[#allocation5 + $0x80] sm:$0xff]  ;;  %v90_v13 = vld [vmem:[#allocation5 + $0x68] sm:$0xff] }
  0x10   :  { %v89_v14 = vld [vmem:[#allocation5 + $0x50] sm:$0xff]  ;;  %v88_v15 = vld [vmem:[#allocation5 + $0x38] sm:$0xff]  ;;  %v87_v16 = vld [vmem:[#allocation5 + $0x20] sm:$0xff] }
  0x11   :  { %104 = vmatpush.msra.mxu1 %v99_v4  ;;  %v86_v17 = vld [vmem:[#allocation5 + $0x8] sm:$0xff]  ;;  %v155_v33 = vld [vmem:[#allocation5 + $0x178] sm:$0xff]  ;;  %v154_v34 = vld [vmem:[#allocation5 + $0x160] sm:$0xff] }
  0x12   :  { %156 = vmatpush.msra.mxu2 %v155_v33  ;;  %v153_v35 = vld [vmem:[#allocation5 + $0x148] sm:$0xff]  ;;  %v152_v36 = vld [vmem:[#allocation5 + $0x130] sm:$0xff]  ;;  %v151_v37 = vld [vmem:[#allocation5 + $0x118] sm:$0xff] }
  0x13   :  { %105 = vmatpush.msra.mxu1 %v98_v5  ;;  %v150_v38 = vld [vmem:[#allocation5 + $0x100] sm:$0xff]  ;;  %v149_v39 = vld [vmem:[#allocation5 + $0xe8] sm:$0xff]  ;;  %v148_v40 = vld [vmem:[#allocation5 + $0xd0] sm:$0xff] }
  0x14   :  { %157 = vmatpush.msra.mxu2 %v154_v34  ;;  %v147_v41 = vld [vmem:[#allocation5 + $0xb8] sm:$0xff]  ;;  %v146_v42 = vld [vmem:[#allocation5 + $0xa0] sm:$0xff]  ;;  %v145_v43 = vld [vmem:[#allocation5 + $0x88] sm:$0xff] }
  0x15   :  { %106 = vmatpush.msra.mxu1 %v97_v6  ;;  %v144_v44 = vld [vmem:[#allocation5 + $0x70] sm:$0xff]  ;;  %v143_v45 = vld [vmem:[#allocation5 + $0x58] sm:$0xff]  ;;  %v142_v46 = vld [vmem:[#allocation5 + $0x40] sm:$0xff] }
  0x16   :  { %158 = vmatpush.msra.mxu2 %v153_v35  ;;  %v141_v47 = vld [vmem:[#allocation5 + $0x28] sm:$0xff]  ;;  %v140_v48 = vld [vmem:[#allocation5 + $0x10] sm:$0xff] }
  0x17   :  { %107 = vmatpush.msra.mxu1 %v96_v7 }
  0x18   :  { %159 = vmatpush.msra.mxu2 %v152_v36 }
  0x19   :  { %108 = vmatpush.msra.mxu1 %v95_v8 }
  0x1a   :  { %160 = vmatpush.msra.mxu2 %v151_v37 }
  0x1b   :  { %109 = vmatpush.msra.mxu1 %v94_v9 }
  0x1c   :  { %161 = vmatpush.msra.mxu2 %v150_v38 }
  0x1d   :  { %110 = vmatpush.msra.mxu1 %v93_v10 }
  0x1e   :  { %162 = vmatpush.msra.mxu2 %v149_v39 }
  0x1f   :  { %111 = vmatpush.msra.mxu1 %v92_v11 }
  0x20   :  { %163 = vmatpush.msra.mxu2 %v148_v40 }
  0x21   :  { %112 = vmatpush.msra.mxu1 %v91_v12 }
  0x22   :  { %164 = vmatpush.msra.mxu2 %v147_v41 }
  0x23   :  { %113 = vmatpush.msra.mxu1 %v90_v13 }
  0x24   :  { %165 = vmatpush.msra.mxu2 %v146_v42 }
  0x25   :  { %114 = vmatpush.msra.mxu1 %v89_v14 }
  0x26   :  { %166 = vmatpush.msra.mxu2 %v145_v43 }
  0x27   :  { %115 = vmatpush.msra.mxu1 %v88_v15 }
  0x28   :  { %167 = vmatpush.msra.mxu2 %v144_v44 }
  0x29   :  { %116 = vmatpush.msra.mxu1 %v87_v16 }
  0x2a   :  { %168 = vmatpush.msra.mxu2 %v143_v45 }
  0x2b   :  { %117 = vmatpush.msra.mxu1 %v86_v17 }
  0x2c   :  { %169 = vmatpush.msra.mxu2 %v142_v46 }
  0x2e   :  { %170 = vmatpush.msra.mxu2 %v141_v47 }
  0x30   :  { %171 = vmatpush.msra.mxu2 %v140_v48 }
  0x8a   :  { %v65_v18 = vpop.f32.mrf.mxu0 }
  0x8b   :  { %v68_v19 = vsub.f32 0.0, %v65_v18 }
  0x8d   :  { %v69_v20 = vmul.f32 1.442695, %v68_v19 }
  0x8f   :  { %201 = vpow2.f32 %v69_v20 }
  0x95   :  { %v202_v21 = vpop.eup %201 }
  0x96   :  { %v71_v22 = vadd.f32 1.0, %v202_v21 }
  0x98   :  { %203 = vrcp.f32 %v71_v22  ;;  %v83_v26 = vand.u32 2147483648, %v71_v22  ;;  %v81_v28 = vand.u32 2147483647, %v71_v22  ;;  %vm77_vm2 = vweird.f32 %v71_v22 }
  0x9a   :  { %v84_v30 = vor.u32 1.1754944e-38, %v83_v26  ;;  %vm82_vm4 = vcmp.eq.f32.partialorder %v81_v28, 8.507059e+37 }
  0x9e   :  { %v204_v23 = vpop.eup %203 }
  0x9f   :  { %v73_v24 = vmul.f32 %v204_v23, %v71_v22  ;;  %vm78_vm1 = vweird.f32 %v204_v23 }
  0xa0   :  { %vm79_vm3 = vmor %vm77_vm2, %vm78_vm1 }
  0xa1   :  { %v74_v25 = vsub.f32 1.0, %v73_v24 }
  0xa3   :  { %v75_v27 = vmul.f32 %v204_v23, %v74_v25 }
  0xa5   :  { %v76_v29 = vadd.f32 %v204_v23, %v75_v27 }
  0xa7   :  { %v80_v31 = vsel %vm79_vm3, %v204_v23, %v76_v29 }
  0xa8   :  { %v85_v32 = vsel %vm82_vm4, %v84_v30, %v80_v31 }
  0xa9   :  { %118 = vmatmul.f32.vlgmr.msra.gmra.mxu1 %v85_v32 }
 0x126   :  { %v119_v49 = vpop.f32.mrf.mxu1 }
 0x127   :  { %v122_v50 = vsub.f32 0.0, %v119_v49 }
 0x129   :  { %v123_v51 = vmul.f32 1.442695, %v122_v50 }
 0x12b   :  { %205 = vpow2.f32 %v123_v51 }
 0x131   :  { %v206_v52 = vpop.eup %205 }
 0x132   :  { %v125_v53 = vadd.f32 1.0, %v206_v52 }
 0x134   :  { %207 = vrcp.f32 %v125_v53  ;;  %v137_v57 = vand.u32 2147483648, %v125_v53  ;;  %v135_v59 = vand.u32 2147483647, %v125_v53  ;;  %vm131_vm6 = vweird.f32 %v125_v53 }
 0x136   :  { %v138_v61 = vor.u32 1.1754944e-38, %v137_v57  ;;  %vm136_vm8 = vcmp.eq.f32.partialorder %v135_v59, 8.507059e+37 }
 0x13a   :  { %v208_v54 = vpop.eup %207 }
 0x13b   :  { %v127_v55 = vmul.f32 %v208_v54, %v125_v53  ;;  %vm132_vm5 = vweird.f32 %v208_v54 }
 0x13c   :  { %vm133_vm7 = vmor %vm131_vm6, %vm132_vm5 }
 0x13d   :  { %v128_v56 = vsub.f32 1.0, %v127_v55 }
 0x13f   :  { %v129_v58 = vmul.f32 %v208_v54, %v128_v56 }
 0x141   :  { %v130_v60 = vadd.f32 %v208_v54, %v129_v58 }
 0x143   :  { %v134_v62 = vsel %vm133_vm7, %v208_v54, %v130_v60 }
 0x144   :  { %v139_v63 = vsel %vm136_vm8, %v138_v61, %v134_v62 }
 0x145   :  { %172 = vmatmul.f32.vlgmr.msra.gmra.mxu2 %v139_v63 }
 0x1c8   :  { %v173_v0 = vpop.f32.mrf.mxu2 }
 0x1c9   :  { %176 = vst.msk [vmem:[#allocation7] sm:$0xff] %vm44_vm0, %v173_v0 }
 0x1ca   :  { %187 = dma.vmem_to_hbm [thread:$0]  %s183_s1, 128, %s185_s23, [#allocation4]  }
 0x1cb   :  { %285 = dma.done.wait [#allocation4], 128  }
 0x1cc   :  { %286 = vsyncadd [#allocation4], 4294967168 }
 0x1cd   :  { %192 = vsyncpa [#allocation3], 1 }
 0x1ce   :  { %193 = vsyncpa [#allocation6], 1 }
 0x1cf   :  { %194 = vsyncpa [#allocation4], 1 }

</bundles_post_ra>
